<compile_context>
chip_gen: v6e
topology: v6e:2x2x1
jax: 0.10.0
libtpu: 0.0.40
codegen_flags: <defaults>
</compile_context>

<pallas_src>
import functools

import jax
import jax.numpy as jnp
from jax.experimental import pallas as pl
from jax.experimental.pallas import tpu as pltpu


# ----------------------------------------------------------------------------
# Kernel: one row block (tr rows of the flattened batch*agents axis) per grid step.
# ----------------------------------------------------------------------------
def rnn_gru_kernel(inp_ref, h_ref, w1_ref, b1_ref, wgx_ref, wgh_ref, bg_ref,
                   h_out_ref, *, hidden):
    f32 = jnp.float32
    H = hidden

    # fc1 + ReLU
    x = jnp.maximum(
        jnp.dot(inp_ref[...], w1_ref[...], preferred_element_type=f32) + b1_ref[...],
        0.0)                                                              # (tr, H)
    hprev = h_ref[...]                                                    # (tr, H)

    # Packed GRU gates: g = [r_pre | z_pre | (Win x + bin) | (Whn h + bhn)], N = 4H = 128 lanes.
    g = (jnp.dot(x, wgx_ref[...], preferred_element_type=f32)
         + jnp.dot(hprev, wgh_ref[...], preferred_element_type=f32)
         + bg_ref[...])                                                   # (tr, 4H)

    r = jax.nn.sigmoid(g[:, 0:H])
    z = jax.nn.sigmoid(g[:, H:2 * H])
    n = jnp.tanh(g[:, 2 * H:3 * H] + r * g[:, 3 * H:4 * H])
    h_out_ref[...] = (1.0 - z) * n + z * hprev


# ----------------------------------------------------------------------------
# Wrapper
# ----------------------------------------------------------------------------
def _pick_row_block(total_rows, target_rows=512, min_blocks=2):
    """Row-block size: ~target_rows rows/step, >= min_blocks blocks when possible
    (v7x megacore), multiple of 8 sublanes. Rows get padded to n_blocks * tr."""
    def round8(x):
        return max(8, ((x + 7) // 8) * 8)
    tr = min(round8(target_rows), round8(pl.cdiv(total_rows, min_blocks)))
    n_blocks = pl.cdiv(total_rows, tr)
    return tr, n_blocks


def rnn_forward(inputs, hidden_state, params, *, target_rows=512, min_blocks=2):
    B, A, E = inputs.shape
    H = hidden_state.shape[-1]
    R = B * A

    inp2 = inputs.reshape(R, E).astype(jnp.float32)
    h_in = hidden_state.reshape(R, H).astype(jnp.float32)

    # Wrapper-side GRU weight packing (lane-dense N = 4H).
    zeros = jnp.zeros((H, H), jnp.float32)
    wg_x = jnp.concatenate([params['wir'], params['wiz'], params['win'], zeros], axis=1)  # (H, 4H)
    wg_h = jnp.concatenate([params['whr'], params['whz'], zeros, params['whn']], axis=1)  # (H, 4H)
    bg = jnp.concatenate([params['bir'] + params['bhr'],
                          params['biz'] + params['bhz'],
                          params['bin'], params['bhn']], axis=1)                          # (1, 4H)

    tr, n_blocks = _pick_row_block(R, target_rows, min_blocks)
    R_pad = tr * n_blocks
    if R_pad != R:
        inp2 = jnp.pad(inp2, ((0, R_pad - R), (0, 0)))
        h_in = jnp.pad(h_in, ((0, R_pad - R), (0, 0)))

    def resident(arr):
        # Constant index_map -> weight stays VMEM-resident across grid steps.
        zero_idx = (0,) * arr.ndim
        return pl.BlockSpec(arr.shape, lambda b: zero_idx)

    weights = (params['w1'], params['b1'], wg_x, wg_h, bg)

    h_out = pl.pallas_call(
        functools.partial(rnn_gru_kernel, hidden=H),
        grid=(n_blocks,),
        in_specs=([pl.BlockSpec((tr, E), lambda b: (b, 0)),
                   pl.BlockSpec((tr, H), lambda b: (b, 0))]
                  + [resident(w) for w in weights]),
        out_specs=pl.BlockSpec((tr, H), lambda b: (b, 0)),
        out_shape=jax.ShapeDtypeStruct((R_pad, H), jnp.float32),
        compiler_params=pltpu.CompilerParams(
            dimension_semantics=("parallel",),
            vmem_limit_bytes=32 * 1024 * 1024),
    )(inp2, h_in, *weights)

    return h_out[:R].reshape(B, A, H)


# ----------------------------------------------------------------------------
# Pure-JAX reference (for correctness check) — exact PyTorch GRUCell math.
# ----------------------------------------------------------------------------
def reference_forward(inputs, hidden_state, p):
    B, A, E = inputs.shape
    H = hidden_state.shape[-1]
    x = jnp.maximum(inputs.reshape(-1, E) @ p['w1'] + p['b1'], 0.0)
    hprev = hidden_state.reshape(-1, H)
    r = jax.nn.sigmoid(x @ p['wir'] + p['bir'] + hprev @ p['whr'] + p['bhr'])
    z = jax.nn.sigmoid(x @ p['wiz'] + p['biz'] + hprev @ p['whz'] + p['bhz'])
    n = jnp.tanh(x @ p['win'] + p['bin'] + r * (hprev @ p['whn'] + p['bhn']))
    h = (1.0 - z) * n + z * hprev
    return h.reshape(B, A, H)


# ----------------------------------------------------------------------------
# Deterministic parameter init (PyTorch-style uniform bounds, synthetic)
# ----------------------------------------------------------------------------
def init_params(key, obs_dim, hidden):
    def lin(key, fan_in, fan_out):
        k1, k2 = jax.random.split(key)
        bound = 1.0 / jnp.sqrt(jnp.float32(fan_in))
        w = jax.random.uniform(k1, (fan_in, fan_out), jnp.float32, -bound, bound)
        b = jax.random.uniform(k2, (1, fan_out), jnp.float32, -bound, bound)
        return w, b

    keys = jax.random.split(key, 7)
    p = {}
    p['w1'], p['b1'] = lin(keys[0], obs_dim, hidden)
    p['wir'], p['bir'] = lin(keys[1], hidden, hidden)
    p['wiz'], p['biz'] = lin(keys[2], hidden, hidden)
    p['win'], p['bin'] = lin(keys[3], hidden, hidden)
    p['whr'], p['bhr'] = lin(keys[4], hidden, hidden)
    p['whz'], p['bhz'] = lin(keys[5], hidden, hidden)
    p['whn'], p['bhn'] = lin(keys[6], hidden, hidden)
    return p


if __name__ == "__main__":
    # 32*4 = 128 rows -> 2 "parallel" grid blocks of 64 rows (exercises v7x 2-TC sharding).
    batch, n_agents, obs_dim, hidden = 32, 4, 16, 32

    key = jax.random.PRNGKey(0)
    k_in, k_h, k_p = jax.random.split(key, 3)

    inputs = jax.random.normal(k_in, (batch, n_agents, obs_dim), jnp.float32)
    hidden_state = jax.random.normal(k_h, (batch, n_agents, hidden), jnp.float32)
    params = init_params(k_p, obs_dim, hidden)

    h = jax.block_until_ready(rnn_forward(inputs, hidden_state, params))
    h_ref = reference_forward(inputs, hidden_state, params)

    assert h.shape == (batch, n_agents, hidden)
    assert jnp.max(jnp.abs(h - h_ref)) < 1e-2, "hidden state mismatch vs reference"

    print("KERNEL_OK")
</pallas_src>

<mosaic_0001>
module attributes {stable_mosaic.version = 11 : i64} {
  func.func @rnn_gru_kernel(%arg0: i32, %arg1: memref<64x16xf32, #tpu.memory_space<vmem>>, %arg2: memref<64x32xf32, #tpu.memory_space<vmem>>, %arg3: memref<16x32xf32, #tpu.memory_space<vmem>>, %arg4: memref<1x32xf32, #tpu.memory_space<vmem>>, %arg5: memref<32x128xf32, #tpu.memory_space<vmem>>, %arg6: memref<32x128xf32, #tpu.memory_space<vmem>>, %arg7: memref<1x128xf32, #tpu.memory_space<vmem>>, %arg8: memref<64x32xf32, #tpu.memory_space<vmem>>) attributes {dimension_semantics = [#tpu.dimension_semantics<parallel>], iteration_bounds = array<i64: 2>, scalar_prefetch = 0 : i64, scratch_operands = 0 : i64, tpu.core_type = #tpu.core_type<tc>, window_params = [{transform_indices = @transform_0, window_bounds = array<i64: 64, 16>}, {transform_indices = @transform_1, window_bounds = array<i64: 64, 32>}, {pipeline_mode = #tpu.pipeline_mode<synchronous>, transform_indices = @transform_2, window_bounds = array<i64: 16, 32>}, {pipeline_mode = #tpu.pipeline_mode<synchronous>, transform_indices = @transform_3, window_bounds = array<i64: 1, 32>}, {pipeline_mode = #tpu.pipeline_mode<synchronous>, transform_indices = @transform_4, window_bounds = array<i64: 32, 128>}, {pipeline_mode = #tpu.pipeline_mode<synchronous>, transform_indices = @transform_5, window_bounds = array<i64: 32, 128>}, {pipeline_mode = #tpu.pipeline_mode<synchronous>, transform_indices = @transform_6, window_bounds = array<i64: 1, 128>}, {transform_indices = @transform_7, window_bounds = array<i64: 64, 32>}]} {
    %c0 = arith.constant 0 : index
    %c0_0 = arith.constant 0 : index
    %0 = vector.load %arg1[%c0, %c0_0] : memref<64x16xf32, #tpu.memory_space<vmem>>, vector<64x16xf32>
    %c0_1 = arith.constant 0 : index
    %c0_2 = arith.constant 0 : index
    %1 = vector.load %arg3[%c0_1, %c0_2] : memref<16x32xf32, #tpu.memory_space<vmem>>, vector<16x32xf32>
    %cst = arith.constant dense<0.000000e+00> : vector<64x32xf32>
    %2 = tpu.matmul %0, %1, %cst {dimension_numbers = #tpu.dot_dimension_numbers<[1], [0], [0], [1], [0, 0, 1, 1], [], []>} : vector<64x16xf32>, vector<16x32xf32>, vector<64x32xf32> -> vector<64x32xf32>
    %c0_3 = arith.constant 0 : index
    %c0_4 = arith.constant 0 : index
    %3 = vector.load %arg4[%c0_3, %c0_4] : memref<1x32xf32, #tpu.memory_space<vmem>>, vector<1x32xf32>
    %4 = vector.broadcast %3 : vector<1x32xf32> to vector<64x32xf32>
    %5 = arith.addf %2, %4 : vector<64x32xf32>
    %cst_5 = arith.constant 0.000000e+00 : f32
    %6 = vector.broadcast %cst_5 : f32 to vector<64x32xf32>
    %7 = arith.maximumf %5, %6 : vector<64x32xf32>
    %c0_6 = arith.constant 0 : index
    %c0_7 = arith.constant 0 : index
    %8 = vector.load %arg2[%c0_6, %c0_7] : memref<64x32xf32, #tpu.memory_space<vmem>>, vector<64x32xf32>
    %c0_8 = arith.constant 0 : index
    %c0_9 = arith.constant 0 : index
    %9 = vector.load %arg5[%c0_8, %c0_9] : memref<32x128xf32, #tpu.memory_space<vmem>>, vector<32x128xf32>
    %cst_10 = arith.constant dense<0.000000e+00> : vector<64x128xf32>
    %10 = tpu.matmul %7, %9, %cst_10 {dimension_numbers = #tpu.dot_dimension_numbers<[1], [0], [0], [1], [0, 0, 1, 1], [], []>} : vector<64x32xf32>, vector<32x128xf32>, vector<64x128xf32> -> vector<64x128xf32>
    %c0_11 = arith.constant 0 : index
    %c0_12 = arith.constant 0 : index
    %11 = vector.load %arg6[%c0_11, %c0_12] : memref<32x128xf32, #tpu.memory_space<vmem>>, vector<32x128xf32>
    %cst_13 = arith.constant dense<0.000000e+00> : vector<64x128xf32>
    %12 = tpu.matmul %8, %11, %cst_13 {dimension_numbers = #tpu.dot_dimension_numbers<[1], [0], [0], [1], [0, 0, 1, 1], [], []>} : vector<64x32xf32>, vector<32x128xf32>, vector<64x128xf32> -> vector<64x128xf32>
    %13 = arith.addf %10, %12 : vector<64x128xf32>
    %c0_14 = arith.constant 0 : index
    %c0_15 = arith.constant 0 : index
    %14 = vector.load %arg7[%c0_14, %c0_15] : memref<1x128xf32, #tpu.memory_space<vmem>>, vector<1x128xf32>
    %15 = vector.broadcast %14 : vector<1x128xf32> to vector<64x128xf32>
    %16 = arith.addf %13, %15 : vector<64x128xf32>
    %17 = vector.extract_strided_slice %16 {offsets = [0, 0], sizes = [64, 32], strides = [1, 1]} : vector<64x128xf32> to vector<64x32xf32>
    %18 = arith.negf %17 : vector<64x32xf32>
    %19 = math.exp %18 : vector<64x32xf32>
    %cst_16 = arith.constant 1.000000e+00 : f32
    %20 = vector.broadcast %cst_16 : f32 to vector<64x32xf32>
    %21 = arith.addf %20, %19 : vector<64x32xf32>
    %22 = arith.divf %20, %21 : vector<64x32xf32>
    %23 = vector.extract_strided_slice %16 {offsets = [0, 32], sizes = [64, 32], strides = [1, 1]} : vector<64x128xf32> to vector<64x32xf32>
    %24 = arith.negf %23 : vector<64x32xf32>
    %25 = math.exp %24 : vector<64x32xf32>
    %cst_17 = arith.constant 1.000000e+00 : f32
    %26 = vector.broadcast %cst_17 : f32 to vector<64x32xf32>
    %27 = arith.addf %26, %25 : vector<64x32xf32>
    %28 = arith.divf %26, %27 : vector<64x32xf32>
    %29 = vector.extract_strided_slice %16 {offsets = [0, 64], sizes = [64, 32], strides = [1, 1]} : vector<64x128xf32> to vector<64x32xf32>
    %30 = vector.extract_strided_slice %16 {offsets = [0, 96], sizes = [64, 32], strides = [1, 1]} : vector<64x128xf32> to vector<64x32xf32>
    %31 = arith.mulf %22, %30 : vector<64x32xf32>
    %32 = arith.addf %29, %31 : vector<64x32xf32>
    %33 = math.tanh %32 : vector<64x32xf32>
    %cst_18 = arith.constant 1.000000e+00 : f32
    %34 = vector.broadcast %cst_18 : f32 to vector<64x32xf32>
    %35 = arith.subf %34, %28 : vector<64x32xf32>
    %36 = arith.mulf %35, %33 : vector<64x32xf32>
    %37 = arith.mulf %28, %8 : vector<64x32xf32>
    %38 = arith.addf %36, %37 : vector<64x32xf32>
    %c0_19 = arith.constant 0 : index
    %c0_20 = arith.constant 0 : index
    %39 = vector.load %arg8[%c0_19, %c0_20] : memref<64x32xf32, #tpu.memory_space<vmem>>, vector<64x32xf32>
    tpu.vector_store %arg8[%c0_19, %c0_20], %38 {strides = array<i32>} : memref<64x32xf32, #tpu.memory_space<vmem>>, vector<64x32xf32>,
    return
  }
  func.func @transform_0(%arg0: i32) -> (i32, i32) {
    %c0_i32 = arith.constant 0 : i32
    %c0_i32_0 = arith.constant 0 : i32
    return %arg0, %c0_i32 : i32, i32
  }
  func.func @transform_1(%arg0: i32) -> (i32, i32) {
    %c0_i32 = arith.constant 0 : i32
    %c0_i32_0 = arith.constant 0 : i32
    return %arg0, %c0_i32 : i32, i32
  }
  func.func @transform_2(%arg0: i32) -> (i32, i32) {
    %c0_i32 = arith.constant 0 : i32
    %c0_i32_0 = arith.constant 0 : i32
    %c0_i32_1 = arith.constant 0 : i32
    return %c0_i32, %c0_i32_0 : i32, i32
  }
  func.func @transform_3(%arg0: i32) -> (i32, i32) {
    %c0_i32 = arith.constant 0 : i32
    %c0_i32_0 = arith.constant 0 : i32
    %c0_i32_1 = arith.constant 0 : i32
    return %c0_i32, %c0_i32_0 : i32, i32
  }
  func.func @transform_4(%arg0: i32) -> (i32, i32) {
    %c0_i32 = arith.constant 0 : i32
    %c0_i32_0 = arith.constant 0 : i32
    %c0_i32_1 = arith.constant 0 : i32
    return %c0_i32, %c0_i32_0 : i32, i32
  }
  func.func @transform_5(%arg0: i32) -> (i32, i32) {
    %c0_i32 = arith.constant 0 : i32
    %c0_i32_0 = arith.constant 0 : i32
    %c0_i32_1 = arith.constant 0 : i32
    return %c0_i32, %c0_i32_0 : i32, i32
  }
  func.func @transform_6(%arg0: i32) -> (i32, i32) {
    %c0_i32 = arith.constant 0 : i32
    %c0_i32_0 = arith.constant 0 : i32
    %c0_i32_1 = arith.constant 0 : i32
    return %c0_i32, %c0_i32_0 : i32, i32
  }
  func.func @transform_7(%arg0: i32) -> (i32, i32) {
    %c0_i32 = arith.constant 0 : i32
    %c0_i32_0 = arith.constant 0 : i32
    return %arg0, %c0_i32 : i32, i32
  }
}

</mosaic_0001>

<bundles_post_ra>
// kernel: tpu_custom_call.1
= control target key start
LH: loop header
LB: loop body
LE: loop exit
PB: predicated region body
PF: predicated region fallthrough
CT: control target
= control target key end

     0   :  { %s1332_s24 = smov 0   ;;  %s1569_s0 = inlined_call_operand.vmem [shape: f32[128,16], index: 0, kind: input, shape index: {}]   ;;  %s1570_s1 = inlined_call_operand.vmem [shape: f32[128,32], index: 1, kind: input, shape index: {}]   ;;  %s1571_s2 = inlined_call_operand.vmem [shape: f32[16,32], index: 2, kind: input, shape index: {}]   ;;  %s1572_s3 = inlined_call_operand.vmem [shape: f32[1,32], index: 3, kind: input, shape index: {}]   ;;  %s1573_s4 = inlined_call_operand.vmem [shape: f32[32,128], index: 4, kind: input, shape index: {}]   ;;  %s1574_s5 = inlined_call_operand.vmem [shape: f32[32,128], index: 5, kind: input, shape index: {}]   ;;  %s1575_s6 = inlined_call_operand.vmem [shape: f32[1,128], index: 6, kind: input, shape index: {}]   ;;  %s1576_s7 = inlined_call_operand.vmem [shape: f32[128,32], index: 7, kind: output, shape index: {}]  }
   0x1 LB: > { %s1081_s25 = sadd.s32 4294967295, %s1287_s24   ;;  %p1085_p0 = scmp.ge.s32.totalorder %s1287_s24, 1  ;;  %s1287_s24 = sphi %s1332_s24, %s17_s24  }
   0x2   : > { %p249_p1 = scmp.lt.s32.totalorder %s1287_s24, 3 }
   0x4   : > { %p250_p2 = pnand %p1085_p0, %p249_p1 }
   0x5   : > { %s1086_s30 = sshll.u32 (!%p250_p2), %s1081_s25, 3  ;;  %s1289_s14 = smov (!%p250_p2), 32  }
   0x6   : > { %253 = sbr.rel (%p250_p2) target bundleno = 919 (0x397), region = 48  ;;  %p287_p3 = scmp.lt.s32.totalorder (!%p250_p2), %s1086_s30, 15 }
   0x7   : > { %s1291_s16 = smov (!%p250_p2), 96  }
   0xb   : > { %v313_v0 = vld [vmem:[%s1571_s2 + $0x8] sm:$0xff]  ;;  %v312_v1 = vld [vmem:[%s1571_s2] sm:$0xff]  ;;  %v474_v2 = vld [vmem:[%s1574_s5 + $0x18] sm:$0xff]  ;;  %s1578_s30 = smov (!%p287_p3, %s1086_s30), 15  ;;  %vm321_vm0 = vcmask 130048   ;;  %vm475_vm1 = vcmask 261120  }
   0xc   : > { %1162 = vmatprep.subr.mxu0 %v313_v0  ;;  %1218 = vmatprep.subr.mxu1 %v313_v0  ;;  %v470_v3 = vld [vmem:[%s1573_s4 + $0x18] sm:$0xff]  ;;  %s1352_s12 = sshll.u32 %s1578_s30, 3  ;;  %v473_v12 = vld [vmem:[%s1574_s5 + $0x10] sm:$0xff]  ;;  %v472_v14 = vld [vmem:[%s1574_s5 + $0x8] sm:$0xff] }
   0xd   : > { %1163 = vmatpush3.msra.mxu0 %v313_v0  ;;  %1220 = vmatpush3.msra.mxu1 %v313_v0  ;;  %s290_s15 = scalar_lea.vmem %s1569_s0, %s1352_s12  ;;  %v469_v13 = vld [vmem:[%s1573_s4 + $0x10] sm:$0xff]  ;;  %v468_v15 = vld [vmem:[%s1573_s4 + $0x8] sm:$0xff]  ;;  %v471_v16 = vld [vmem:[%s1574_s5] sm:$0xff]  ;;  %s296_s29 = scalar_lea.vmem %s1570_s1, %s1352_s12 }
   0xe   : > { %1164 = vmatprep.subr.mxu0 %v312_v1  ;;  %1219 = vmatprep.subr.mxu1 %v312_v1  ;;  %v304_v4 = vld [vmem:[%s290_s15] sm:$0xff]  ;;  %v305_v5 = vld [vmem:[%s290_s15 + $0x8] sm:$0xff]  ;;  %v306_v6 = vld [vmem:[%s290_s15 + $0x10] sm:$0xff]  ;;  %s302_s19 = scalar_lea.vmem %s1576_s7, %s1352_s12 }
   0xf   : > { %1165 = vmatpush3.msra.mxu0 %v312_v1  ;;  %1221 = vmatpush3.msra.mxu1 %v312_v1  ;;  %v308_v7 = vld [vmem:[%s290_s15 + $0x20] sm:$0xff]  ;;  %v309_v8 = vld [vmem:[%s290_s15 + $0x28] sm:$0xff]  ;;  %v310_v9 = vld [vmem:[%s290_s15 + $0x30] sm:$0xff] }
  0x10   : > { %1178 = vmatprep.subr.mxu1 %v474_v2  ;;  %1198 = vmatprep.subr.mxu0 %v470_v3  ;;  %v307_v10 = vld [vmem:[%s290_s15 + $0x18] sm:$0xff]  ;;  %v1385_v17 = vld [vmem:[%s296_s29] sm:$0xff]  ;;  %v1390_v19 = vld [vmem:[%s296_s29 + $0x8] sm:$0xff] }
  0x11   : > { %1166 = vmatprep.mubr.msk.f32.mxu0 %vm321_vm0, %v304_v4  ;;  %1172 = vmatprep.mubr.msk.f32.mxu1 %vm321_vm0, %v308_v7  ;;  %v311_v11 = vld [vmem:[%s290_s15 + $0x38] sm:$0xff]  ;;  %v467_v18 = vld [vmem:[%s1573_s4] sm:$0xff]  ;;  %v1396_v20 = vld [vmem:[%s296_s29 + $0x10] sm:$0xff]  ;;  %s1290_s15 = smov 64  }
  0x12   : > { %1167 = vmatmul.mubr.msk.f32.vlgmr.msra.gmra.mxu0 %vm321_vm0, %v305_v5  ;;  %1173 = vmatmul.mubr.msk.f32.vlgmr.msra.gmra.mxu1 %vm321_vm0, %v309_v8  ;;  %v1400_v21 = vld [vmem:[%s296_s29 + $0x18] sm:$0xff]  ;;  %v1404_v22 = vld [vmem:[%s296_s29 + $0x20] sm:$0xff]  ;;  %v1408_v23 = vld [vmem:[%s296_s29 + $0x28] sm:$0xff] }
  0x13   : > { %1169 = vmatprep.mubr.msk.f32.mxu0 %vm321_vm0, %v306_v6  ;;  %1175 = vmatprep.mubr.msk.f32.mxu1 %vm321_vm0, %v310_v9  ;;  %v1412_v24 = vld [vmem:[%s296_s29 + $0x30] sm:$0xff]  ;;  %v1416_v25 = vld [vmem:[%s296_s29 + $0x38] sm:$0xff]  ;;  %v1092_v26 = vld [vmem:[%s1572_s3] ss:$0 sm:$0xff] }
  0x14   : > { %1179 = vmatpush3.msra.mxu1 %v474_v2  ;;  %1199 = vmatpush3.msra.mxu0 %v470_v3  ;;  %v1117_v56 = vld [vmem:[%s1575_s6] ss:$0 sm:$0xff] }
  0x15   : > { %1180 = vmatprep.subr.mxu1 %v473_v12  ;;  %1200 = vmatprep.subr.mxu0 %v469_v13 }
  0x16   : > { %1170 = vmatmul.mubr.msk.f32.gmra.mxu0 %vm321_vm0, %v307_v10  ;;  %1176 = vmatmul.mubr.msk.f32.gmra.mxu1 %vm321_vm0, %v311_v11 }
  0x17   : > { %1181 = vmatpush3.msra.mxu1 %v473_v12  ;;  %1201 = vmatpush3.msra.mxu0 %v469_v13 }
  0x18   : > { %1182 = vmatprep.subr.mxu1 %v472_v14  ;;  %1202 = vmatprep.subr.mxu0 %v468_v15 }
  0x19   : > { %1183 = vmatpush3.msra.mxu1 %v472_v14  ;;  %1203 = vmatpush3.msra.mxu0 %v468_v15 }
  0x1a   : > { %1184 = vmatprep.subr.mxu1 %v471_v16  ;;  %1186 = vmatprep.mubr.msk.f32.mxu1 %vm475_vm1, %v1385_v17 }
  0x1b   : > { %1185 = vmatpush3.msra.mxu1 %v471_v16  ;;  %1204 = vmatprep.subr.mxu0 %v467_v18 }
  0x1c   : > { %1187 = vmatmul.mubr.msk.f32.vlgmr.msra.gmra.mxu1 %vm475_vm1, %v1390_v19  ;;  %1205 = vmatpush3.msra.mxu0 %v467_v18 }
  0x1d   : > { %1189 = vmatprep.mubr.msk.f32.mxu1 %vm475_vm1, %v1396_v20 }
  0x20   : > { %1190 = vmatmul.mubr.msk.f32.gmra.mxu1 %vm475_vm1, %v1400_v21 }
  0x21   : > { %1192 = vmatprep.mubr.msk.f32.mxu1 %vm475_vm1, %v1404_v22 }
  0x24   : > { %1193 = vmatmul.mubr.msk.f32.gmra.mxu1 %vm475_vm1, %v1408_v23 }
  0x25   : > { %1195 = vmatprep.mubr.msk.f32.mxu1 %vm475_vm1, %v1412_v24 }
  0x28   : > { %1196 = vmatmul.mubr.msk.f32.gmra.mxu1 %vm475_vm1, %v1416_v25 }
  0xd2   : > { %v1168_v27 = vpop.f32.mrf.mxu0  ;;  %v1174_v28 = vpop.f32.mrf.mxu1 }
  0xd3   : > { %v418_v29 = vadd.f32 %v1168_v27, %v1092_v26  ;;  %v438_v42 = vadd.f32 %v1174_v28, %v1092_v26 }
  0xd4   : > { %v412_v30 = vpop.f32.mrf.mxu0  ;;  %v432_v32 = vpop.f32.mrf.mxu1 }
  0xd5   : > { %v413_v31 = vadd.f32 %v1092_v26, %v412_v30  ;;  %v433_v35 = vadd.f32 %v1092_v26, %v432_v32  ;;  %v452_v37 = vmax.f32 %v418_v29, 0.0  ;;  %v456_v47 = vmax.f32 %v438_v42, 0.0 }
  0xd6   : > { %v1171_v33 = vpop.f32.mrf.mxu0  ;;  %v1177_v36 = vpop.f32.mrf.mxu1 }
  0xd7   : > { %v451_v34 = vmax.f32 %v413_v31, 0.0  ;;  %v428_v38 = vadd.f32 %v1171_v33, %v1092_v26  ;;  %v455_v44 = vmax.f32 %v433_v35, 0.0  ;;  %v448_v48 = vadd.f32 %v1177_v36, %v1092_v26 }
  0xd8   : > { %v422_v39 = vpop.f32.mrf.mxu0  ;;  %v442_v41 = vpop.f32.mrf.mxu1 }
  0xd9   : > { %v423_v40 = vadd.f32 %v1092_v26, %v422_v39  ;;  %1206 = vmatprep.mubr.msk.f32.mxu0 %vm475_vm1, %v451_v34  ;;  %v443_v45 = vadd.f32 %v1092_v26, %v442_v41  ;;  %v454_v46 = vmax.f32 %v428_v38, 0.0  ;;  %v458_v50 = vmax.f32 %v448_v48, 0.0 }
  0xda   : > { %1207 = vmatmul.mubr.msk.f32.vlgmr.msra.gmra.mxu0 %vm475_vm1, %v452_v37 }
  0xdb   : > { %v453_v43 = vmax.f32 %v423_v40, 0.0  ;;  %v457_v49 = vmax.f32 %v443_v45, 0.0 }
  0xdc   : > { %v1188_v51 = vpop.f32.mrf.mxu1 }
  0xdd   : > { %1209 = vmatprep.mubr.msk.f32.mxu0 %vm475_vm1, %v453_v43 }
  0xde   : > { %1210 = vmatmul.mubr.msk.f32.gmra.mxu0 %vm475_vm1, %v454_v46  ;;  %v566_v52 = vpop.f32.mrf.mxu1 }
  0xdf   : > { %1212 = vmatprep.mubr.msk.f32.mxu0 %vm475_vm1, %v455_v44 }
  0xe0   : > { %v1191_v53 = vpop.f32.mrf.mxu1 }
  0xe2   : > { %1213 = vmatmul.mubr.msk.f32.gmra.mxu0 %vm475_vm1, %v456_v47  ;;  %v576_v54 = vpop.f32.mrf.mxu1 }
  0xe3   : > { %1215 = vmatprep.mubr.msk.f32.mxu0 %vm475_vm1, %v457_v49 }
  0xe4   : > { %v1194_v57 = vpop.f32.mrf.mxu1 }
  0xe6   : > { %1216 = vmatmul.mubr.msk.f32.gmra.mxu0 %vm475_vm1, %v458_v50  ;;  %v586_v63 = vpop.f32.mrf.mxu1 }
  0xe8   : > { %v1197_v6 = vpop.f32.mrf.mxu1 }
  0xea   : > { %v596_v12 = vpop.f32.mrf.mxu1 }
 0x19a   : > { %v1208_v55 = vpop.f32.mrf.mxu0 }
 0x19b   : > { %v701_v58 = vadd.f32 %v1208_v55, %v1188_v51 }
 0x19c   : > { %v695_v59 = vpop.f32.mrf.mxu0 }
 0x19d   : > { %v1434_v60 = vadd.f32 %v1117_v56, %v701_v58  ;;  %v696_v61 = vadd.f32 %v695_v59, %v566_v52 }
 0x19e   : > { %v1211_v62 = vpop.f32.mrf.mxu0 }
 0x19f   : > { %v711_v0 = vadd.f32 %v1211_v62, %v1191_v53  ;;  %807 = vrot.lane.b32.xlu0 %v1434_v60, %s1289_s14  ;;  %v1438_v2 = vadd.f32 %v1117_v56, %v696_v61  ;;  %v1119_v28 = vmul.f32 -1.442695, %v1434_v60 }
 0x1a0   : > { %v705_v1 = vpop.f32.mrf.mxu0 }
 0x1a1   : > { %v1440_v3 = vadd.f32 %v1117_v56, %v711_v0  ;;  %v706_v4 = vadd.f32 %v705_v1, %v576_v54  ;;  %v1118_v29 = vmul.f32 -1.442695, %v1438_v2  ;;  %1233 = vpow2.f32 %v1119_v28 }
 0x1a2   : > { %v1214_v5 = vpop.f32.mrf.mxu0 }
 0x1a3   : > { %811 = vrot.lane.b32.xlu1 %v1440_v3, %s1289_s14  ;;  %805 = vrot.lane.b32.xlu0 %v1438_v2, %s1289_s14  ;;  %v1446_v8 = vadd.f32 %v1117_v56, %v706_v4  ;;  %v721_v9 = vadd.f32 %v1214_v5, %v1194_v57  ;;  %v1121_v30 = vmul.f32 -1.442695, %v1440_v3  ;;  %1235 = vpow2.f32 %v1118_v29 }
 0x1a4   : > { %v715_v7 = vpop.f32.mrf.mxu0 }
 0x1a5   : > { %v716_v10 = vadd.f32 %v715_v7, %v586_v63  ;;  %v1452_v15 = vadd.f32 %v1117_v56, %v721_v9  ;;  %1237 = vpow2.f32 %v1121_v30  ;;  %v1120_v31 = vmul.f32 -1.442695, %v1446_v8 }
 0x1a6   : > { %v1217_v11 = vpop.f32.mrf.mxu0 }
 0x1a7   : > { %v1448_v13 = vadd.f32 %v1117_v56, %v716_v10  ;;  %809 = vrot.lane.b32.xlu1 %v1446_v8, %s1289_s14  ;;  %v731_v16 = vadd.f32 %v1217_v11, %v1197_v6  ;;  %v1123_v32 = vmul.f32 -1.442695, %v1452_v15  ;;  %1239 = vpow2.f32 %v1120_v31 }
 0x1a8   : > { %v725_v14 = vpop.f32.mrf.mxu0 }
 0x1a9   : > { %v726_v18 = vadd.f32 %v725_v14, %v596_v12  ;;  %813 = vrot.lane.b32.xlu0 %v1448_v13, %s1289_s14  ;;  %v1460_v27 = vadd.f32 %v1117_v56, %v731_v16  ;;  %v1122_v33 = vmul.f32 -1.442695, %v1448_v13  ;;  %1241 = vpow2.f32 %v1123_v32 }
 0x1ab   : > { %v1456_v26 = vadd.f32 %v1117_v56, %v726_v18  ;;  %815 = vrot.lane.b32.xlu1 %v1452_v15, %s1289_s14  ;;  %v1125_v34 = vmul.f32 -1.442695, %v1460_v27  ;;  %1243 = vpow2.f32 %v1122_v33 }
 0x1ad   : > { %817 = vrot.lane.b32.xlu0 %v1456_v26, %s1289_s14  ;;  %v1124_v35 = vmul.f32 -1.442695, %v1456_v26  ;;  %1245 = vpow2.f32 %v1125_v34 }
 0x1ae   : > { %v1234_v36 = vpop.eup %1233 }
 0x1af   : > { %819 = vrot.lane.b32.xlu1 %v1460_v27, %s1289_s14  ;;  %v774_v38 = vadd.f32 1.0, %v1234_v36  ;;  %1247 = vpow2.f32 %v1124_v35 }
 0x1b0   : > { %v1236_v37 = vpop.eup %1235 }
 0x1b1   : > { %v773_v40 = vadd.f32 1.0, %v1236_v37  ;;  %1249 = vrcp.f32 %v774_v38 }
 0x1b2   : > { %v1238_v39 = vpop.eup %1237 }
 0x1b3   : > { %v776_v41 = vadd.f32 1.0, %v1238_v39  ;;  %1251 = vrcp.f32 %v773_v40 }
 0x1b4   : > { %v1240_v42 = vpop.eup %1239 }
 0x1b5   : > { %1253 = vrcp.f32 %v776_v41  ;;  %v775_v44 = vadd.f32 1.0, %v1240_v42 }
 0x1b6   : > { %v1242_v43 = vpop.eup %1241 }
 0x1b7   : > { %v778_v46 = vadd.f32 1.0, %v1242_v43  ;;  %1255 = vrcp.f32 %v775_v44 }
 0x1b8   : > { %v1244_v45 = vpop.eup %1243 }
 0x1b9   : > { %v777_v48 = vadd.f32 1.0, %v1244_v45  ;;  %1257 = vrcp.f32 %v778_v46 }
 0x1ba   : > { %v1246_v47 = vpop.eup %1245 }
 0x1bb   : > { %v780_v50 = vadd.f32 1.0, %v1246_v47  ;;  %1259 = vrcp.f32 %v777_v48 }
 0x1bc   : > { %v1248_v49 = vpop.eup %1247 }
 0x1bd   : > { %v779_v51 = vadd.f32 1.0, %v1248_v49  ;;  %1261 = vrcp.f32 %v780_v50 }
 0x1be   : > { %v1474_v52 = vpop.eup %1249 }
 0x1bf   : > { %1263 = vrcp.f32 %v779_v51  ;;  %v886_v43 = vsub.f32 1.0, %v1474_v52 }
 0x1c0   : > { %v1477_v55 = vpop.eup %1251 }
 0x1c2   : > { %v1479_v56 = vpop.eup %1253 }
 0x1c3   : > { %v888_v49 = vsub.f32 1.0, %v1479_v56 }
 0x1c4   : > { %v1483_v62 = vpop.eup %1255 }
 0x1c6   : > { %v1486_v4 = vpop.eup %1257 }
 0x1c8   : > { %v1488_v5 = vpop.eup %1259 }
 0x1ca   : > { %v1492_v11 = vpop.eup %1261 }
 0x1cc   : > { %v1494_v12 = vpop.eup %1263 }
 0x211   : > { %v808_v53 = vpop.permute.xlu0 %807 }
 0x212   : > { %v830_v54 = vmul.f32 %v1474_v52, %v808_v53 }
 0x214   : > { %847 = vrot.lane.b32.xlu1 %v830_v54, %s1290_s15 }
 0x215   : > { %v812_v57 = vpop.permute.xlu1 %811  ;;  %v806_v58 = vpop.permute.xlu0 %805 }
 0x216   : > { %v832_v59 = vmul.f32 %v1479_v56, %v812_v57  ;;  %v829_v61 = vmul.f32 %v1477_v55, %v806_v58 }
 0x218   : > { %851 = vrot.lane.b32.xlu1 %v832_v59, %s1290_s15  ;;  %845 = vrot.lane.b32.xlu0 %v829_v61, %s1290_s15 }
 0x219   : > { %v810_v63 = vpop.permute.xlu1 %809 }
 0x21a   : > { %v831_v0 = vmul.f32 %v1483_v62, %v810_v63 }
 0x21b   : > { %v814_v1 = vpop.permute.xlu0 %813 }
 0x21c   : > { %849 = vrot.lane.b32.xlu0 %v831_v0, %s1290_s15  ;;  %v833_v7 = vmul.f32 %v1488_v5, %v814_v1 }
 0x21d   : > { %v816_v6 = vpop.permute.xlu1 %815 }
 0x21e   : > { %v834_v9 = vmul.f32 %v1486_v4, %v816_v6 }
 0x21f   : > { %v818_v10 = vpop.permute.xlu0 %817 }
 0x220   : > { %855 = vrot.lane.b32.xlu1 %v834_v9, %s1290_s15  ;;  %853 = vrot.lane.b32.xlu0 %v833_v7, %s1290_s15  ;;  %v835_v16 = vmul.f32 %v1494_v12, %v818_v10  ;;  %v889_v7 = vsub.f32 1.0, %v1488_v5 }
 0x221   : > { %v820_v14 = vpop.permute.xlu1 %819 }
 0x222   : > { %v836_v18 = vmul.f32 %v1492_v11, %v820_v14 }
 0x224   : > { %859 = vrot.lane.b32.xlu1 %v836_v18, %s1290_s15  ;;  %857 = vrot.lane.b32.xlu0 %v835_v16, %s1290_s15 }
 0x228   : > { %935 = vrot.lane.b32.xlu1 %v1390_v19, %s1289_s14  ;;  %933 = vrot.lane.b32.xlu0 %v1385_v17, %s1289_s14 }
 0x22c   : > { %939 = vrot.lane.b32.xlu1 %v1400_v21, %s1289_s14  ;;  %937 = vrot.lane.b32.xlu0 %v1396_v20, %s1289_s14 }
 0x230   : > { %943 = vrot.lane.b32.xlu1 %v1408_v23, %s1289_s14  ;;  %941 = vrot.lane.b32.xlu0 %v1404_v22, %s1289_s14 }
 0x286   : > { %v848_v28 = vpop.permute.xlu1 %847 }
 0x287   : > { %v870_v29 = vadd.f32 %v848_v28, %v1434_v60 }
 0x289   : > { %1265 = vtanh.f32 %v870_v29 }
 0x28a   : > { %v852_v19 = vpop.permute.xlu1 %851  ;;  %v846_v30 = vpop.permute.xlu0 %845 }
 0x28b   : > { %v872_v17 = vadd.f32 %v852_v19, %v1440_v3  ;;  %v869_v31 = vadd.f32 %v846_v30, %v1438_v2  ;;  %v892_v19 = vsub.f32 1.0, %v1492_v11 }
 0x28d   : > { %1267 = vtanh.f32 %v872_v17 }
 0x28e   : > { %1269 = vtanh.f32 %v869_v31  ;;  %v850_v21 = vpop.permute.xlu0 %849 }
 0x28f   : > { %v871_v20 = vadd.f32 %v850_v21, %v1446_v8 }
 0x291   : > { %1271 = vtanh.f32 %v871_v20 }
 0x292   : > { %v856_v23 = vpop.permute.xlu1 %855  ;;  %v854_v32 = vpop.permute.xlu0 %853 }
 0x293   : > { %v874_v22 = vadd.f32 %v856_v23, %v1452_v15  ;;  %v873_v33 = vadd.f32 %v854_v32, %v1448_v13 }
 0x295   : > { %1273 = vtanh.f32 %v874_v22 }
 0x296   : > { %v1266_v60 = vpop.eup %1265  ;;  %1275 = vtanh.f32 %v873_v33  ;;  %v860_v34 = vpop.permute.xlu1 %859 }
 0x297   : > { %v858_v35 = vpop.permute.xlu0 %857  ;;  %v876_v3 = vadd.f32 %v860_v34, %v1460_v27  ;;  %903 = vrot.lane.b32.xlu1 %v1266_v60, %s1291_s16 }
 0x298   : > { %v875_v2 = vadd.f32 %v858_v35, %v1456_v26 }
 0x299   : > { %1277 = vtanh.f32 %v876_v3 }
 0x29a   : > { %v1268_v8 = vpop.eup %1267  ;;  %1279 = vtanh.f32 %v875_v2  ;;  %v936_v38 = vpop.permute.xlu1 %935 }
 0x29b   : > { %v1270_v36 = vpop.eup %1269  ;;  %907 = vrot.lane.b32.xlu1 %v1268_v8, %s1291_s16  ;;  %v934_v39 = vpop.permute.xlu0 %933  ;;  %v958_v45 = vmul.f32 %v1474_v52, %v936_v38  ;;  %v887_v52 = vsub.f32 1.0, %v1483_v62 }
 0x29c   : > { %901 = vrot.lane.b32.xlu0 %v1270_v36, %s1291_s16  ;;  %v957_v54 = vmul.f32 %v1477_v55, %v934_v39 }
 0x29e   : > { %v1272_v13 = vpop.eup %1271  ;;  %v940_v40 = vpop.permute.xlu1 %939 }
 0x29f   : > { %v938_v41 = vpop.permute.xlu0 %937 }
 0x2a0   : > { %905 = vrot.lane.b32.xlu0 %v1272_v13, %s1291_s16  ;;  %v959_v63 = vmul.f32 %v1483_v62, %v938_v41 }
 0x2a2   : > { %v1274_v15 = vpop.eup %1273  ;;  %v944_v42 = vpop.permute.xlu1 %943 }
 0x2a3   : > { %v1276_v37 = vpop.eup %1275  ;;  %911 = vrot.lane.b32.xlu1 %v1274_v15, %s1291_s16  ;;  %v942_v46 = vpop.permute.xlu0 %941 }
 0x2a4   : > { %909 = vrot.lane.b32.xlu0 %v1276_v37, %s1291_s16  ;;  %v961_v14 = vmul.f32 %v1488_v5, %v942_v46 }
 0x2a6   : > { %v1278_v26 = vpop.eup %1277 }
 0x2a7   : > { %v1280_v27 = vpop.eup %1279  ;;  %915 = vrot.lane.b32.xlu1 %v1278_v26, %s1291_s16 }
 0x2a8   : > { %913 = vrot.lane.b32.xlu0 %v1280_v27, %s1291_s16 }
 0x2ab   : > { %947 = vrot.lane.b32.xlu1 %v1416_v25, %s1289_s14  ;;  %v885_v25 = vsub.f32 1.0, %v1477_v55  ;;  %v962_v55 = vmul.f32 %v1486_v4, %v944_v42 }
 0x2ac   : > { %945 = vrot.lane.b32.xlu0 %v1412_v24, %s1289_s14  ;;  %v960_v24 = vmul.f32 %v1479_v56, %v940_v40  ;;  %v890_v56 = vsub.f32 1.0, %v1486_v4  ;;  %v891_v4 = vsub.f32 1.0, %v1494_v12 }
 0x309   : > { %v904_v44 = vpop.permute.xlu1 %903 }
 0x30a   : > { %v926_v47 = vmul.f32 %v904_v44, %v886_v43 }
 0x30c   : > { %v966_v48 = vadd.f32 %v958_v45, %v926_v47 }
 0x30d   : > { %v908_v50 = vpop.permute.xlu1 %907 }
 0x30e   : > { %v928_v51 = vmul.f32 %v908_v50, %v888_v49  ;;  %v902_v53 = vpop.permute.xlu0 %901  ;;  %983 = vrot.lane.b32.xlu1 %v966_v48, %s1291_s16 }
 0x30f   : > { %v925_v57 = vmul.f32 %v902_v53, %v885_v25 }
 0x310   : > { %v968_v58 = vadd.f32 %v960_v24, %v928_v51 }
 0x311   : > { %v965_v59 = vadd.f32 %v957_v54, %v925_v57 }
 0x312   : > { %v906_v61 = vpop.permute.xlu0 %905  ;;  %987 = vrot.lane.b32.xlu1 %v968_v58, %s1291_s16 }
 0x313   : > { %v927_v0 = vmul.f32 %v906_v61, %v887_v52  ;;  %981 = vrot.lane.b32.xlu0 %v965_v59, %s1291_s16 }
 0x315   : > { %v967_v1 = vadd.f32 %v959_v63, %v927_v0  ;;  %v912_v6 = vpop.permute.xlu1 %911 }
 0x316   : > { %v930_v9 = vmul.f32 %v912_v6, %v890_v56  ;;  %v910_v10 = vpop.permute.xlu0 %909 }
 0x317   : > { %v929_v16 = vmul.f32 %v910_v10, %v889_v7  ;;  %985 = vrot.lane.b32.xlu0 %v967_v1, %s1291_s16 }
 0x318   : > { %v970_v18 = vadd.f32 %v962_v55, %v930_v9 }
 0x319   : > { %v969_v62 = vadd.f32 %v961_v14, %v929_v16  ;;  %v916_v28 = vpop.permute.xlu1 %915 }
 0x31a   : > { %v914_v29 = vpop.permute.xlu0 %913  ;;  %991 = vrot.lane.b32.xlu1 %v970_v18, %s1291_s16  ;;  %v932_v17 = vmul.f32 %v916_v28, %v892_v19 }
 0x31b   : > { %989 = vrot.lane.b32.xlu0 %v969_v62, %s1291_s16  ;;  %v931_v21 = vmul.f32 %v914_v29, %v891_v4 }
 0x31d   : > { %v948_v30 = vpop.permute.xlu1 %947 }
 0x31e   : > { %v964_v5 = vmul.f32 %v1492_v11, %v948_v30  ;;  %v946_v31 = vpop.permute.xlu0 %945 }
 0x31f   : > { %v963_v20 = vmul.f32 %v1494_v12, %v946_v31 }
 0x320   : > { %v972_v23 = vadd.f32 %v964_v5, %v932_v17 }
 0x321   : > { %v971_v32 = vadd.f32 %v963_v20, %v931_v21 }
 0x322   : > { %995 = vrot.lane.b32.xlu1 %v972_v23, %s1291_s16 }
 0x323   : > { %993 = vrot.lane.b32.xlu0 %v971_v32, %s1291_s16 }
 0x380   : > { %v984_v22 = vpop.permute.xlu1 %983 }
 0x381   : > { %1006 = vst.msk [vmem:[%s302_s19 + $0x8] sm:$0xff] %vm475_vm1, %v984_v22 }
 0x384   : > { %v988_v33 = vpop.permute.xlu1 %987 }
 0x385   : > { %1008 = vst.msk [vmem:[%s302_s19 + $0x18] sm:$0xff] %vm475_vm1, %v988_v33  ;;  %v982_v11 = vpop.permute.xlu0 %981 }
 0x386   : > { %1005 = vst.msk [vmem:[%s302_s19] sm:$0xff] %vm475_vm1, %v982_v11 }
 0x389   : > { %v986_v12 = vpop.permute.xlu0 %985 }
 0x38a   : > { %1007 = vst.msk [vmem:[%s302_s19 + $0x10] sm:$0xff] %vm475_vm1, %v986_v12 }
 0x38c   : > { %v992_v60 = vpop.permute.xlu1 %991 }
 0x38d   : > { %1010 = vst.msk [vmem:[%s302_s19 + $0x28] sm:$0xff] %vm475_vm1, %v992_v60  ;;  %v990_v34 = vpop.permute.xlu0 %989 }
 0x38e   : > { %1009 = vst.msk [vmem:[%s302_s19 + $0x20] sm:$0xff] %vm475_vm1, %v990_v34 }
 0x394   : > { %v996_v35 = vpop.permute.xlu1 %995 }
 0x395   : > { %1012 = vst.msk [vmem:[%s302_s19 + $0x38] sm:$0xff] %vm475_vm1, %v996_v35  ;;  %v994_v3 = vpop.permute.xlu0 %993 }
 0x396   : > { %1011 = vst.msk [vmem:[%s302_s19 + $0x30] sm:$0xff] %vm475_vm1, %v994_v3 }
 0x397 PF: > { %s17_s24 = sadd.s32 1, %s1287_s24  }
 0x398   : > { %p14_p4 = scmp.ge.s32.totalorder %s17_s24, 4  }
 0x39a   :  { %16 = sbr.rel (!%p14_p4) target bundleno = 1 (0x1), region = 81 }

</bundles_post_ra>
